<compile_context>
chip_gen: v7x
topology: tpu7x:2x2x1
jax: 0.10.0
libtpu: 0.0.40
codegen_flags: <defaults>
</compile_context>

<pallas_src>
import functools

import jax
import jax.numpy as jnp
from jax.experimental import pallas as pl
from jax.experimental.pallas import tpu as pltpu


# ----------------------------- Pallas kernel --------------------------------
def _dlinear_kernel(x_ref, w_ref, b_ref, o_ref):
    # x_ref: (1, L, C)  one batch element, channels on the lane axis (streamed)
    # w_ref: (P, L)     folded weight W_comb^T                        (resident)
    # b_ref: (P, 1)     folded bias bs + bt, f32                      (resident)
    # o_ref: (1, P, C)  output tile
    acc = jnp.dot(w_ref[...], x_ref[0], preferred_element_type=jnp.float32)
    o_ref[0] = (acc + b_ref[...]).astype(o_ref.dtype)


@functools.partial(jax.jit, static_argnames=("compute_dtype",))
def _dlinear_pallas(x, wct, b_comb, compute_dtype=jnp.float32):
    # x: (B, L, C), wct: (P, L), b_comb: (P, 1) -> out: (B, P, C) float32
    B, L, C = x.shape
    P = wct.shape[0]
    xc = x.astype(compute_dtype)
    wc = wct.astype(compute_dtype)
    return pl.pallas_call(
        _dlinear_kernel,
        out_shape=jax.ShapeDtypeStruct((B, P, C), jnp.float32),
        grid_spec=pltpu.PrefetchScalarGridSpec(
            num_scalar_prefetch=0,
            grid=(B,),
            in_specs=[
                pl.BlockSpec((1, L, C), lambda i: (i, 0, 0)),   # streamed per batch
                pl.BlockSpec((P, L), lambda i: (0, 0)),         # resident weight
                pl.BlockSpec((P, 1), lambda i: (0, 0)),         # resident bias
            ],
            out_specs=pl.BlockSpec((1, P, C), lambda i: (i, 0, 0)),
        ),
        compiler_params=pltpu.CompilerParams(
            dimension_semantics=("parallel",),   # v7x: shard B across 2 TCs
        ),
    )(xc, wc, b_comb)


# ------------------------------- glue / model -------------------------------
def make_avg_matrix(seq_len, kernel_size):
    """A (L, L) such that (x @ A)[:, t] == AvgPool1d(replicate_pad(x))[:, t]."""
    pad = (kernel_size - 1) // 2
    t = jnp.arange(seq_len)
    j = jnp.arange(kernel_size)
    src = jnp.clip(t[None, :] - pad + j[:, None], 0, seq_len - 1)      # (k, L)
    cols = jnp.broadcast_to(t[None, :], (kernel_size, seq_len))        # (k, L)
    A = jnp.zeros((seq_len, seq_len), jnp.float32)
    A = A.at[src, cols].add(1.0 / kernel_size)
    return A


class DLinearPallas:
    def __init__(self, seq_len, pred_len, moving_avg, key):
        # Replicate padding of (k-1)//2 on both sides only reproduces the
        # PyTorch module's shapes/semantics for odd kernel sizes.
        assert moving_avg % 2 == 1, "moving_avg must be odd"
        self.seq_len = seq_len
        self.pred_len = pred_len
        self.kernel_size = moving_avg

        # Weights exactly as in the PyTorch module: 1/seq_len * ones.
        w = (1.0 / seq_len) * jnp.ones((pred_len, seq_len), jnp.float32)
        ws_t = w.T                                   # (L, P)
        wt_t = w.T                                   # (L, P)
        # Biases: nn.Linear default init (uniform +/- 1/sqrt(in_features)),
        # made deterministic here.
        bound = 1.0 / (seq_len ** 0.5)
        k1, k2 = jax.random.split(key)
        bs = jax.random.uniform(k1, (pred_len,), jnp.float32, -bound, bound)
        bt = jax.random.uniform(k2, (pred_len,), jnp.float32, -bound, bound)

        # Fold moving-average + both Linears into one GEMM:
        #   W_comb = Ws^T + A @ (Wt^T - Ws^T),  b_comb = bs + bt
        A = make_avg_matrix(seq_len, moving_avg)     # (L, L)
        w_comb = ws_t + A @ (wt_t - ws_t)            # (L, P)
        self.wct = jnp.asarray(w_comb.T)             # (P, L)  kernel weight
        self.b_comb = (bs + bt).reshape(pred_len, 1) # (P, 1)  kernel bias (f32)

        # Keep un-folded params around for the pure-JAX reference.
        self.ws_t, self.wt_t, self.bs, self.bt = ws_t, wt_t, bs, bt

    def __call__(self, x, compute_dtype=jnp.float32):
        # x: (B, seq_len, C) -- same convention as the PyTorch module input.
        B, L, C = x.shape
        assert L == self.seq_len
        return _dlinear_pallas(x, self.wct, self.b_comb,
                               compute_dtype=compute_dtype)   # (B, pred_len, C)

    def reference(self, x):
        """Pure-JAX reference mirroring the PyTorch forward (f32, un-folded)."""
        B, L, C = x.shape
        pad = (self.kernel_size - 1) // 2
        xc = jnp.transpose(x, (0, 2, 1))                        # (B, C, L)
        xp = jnp.pad(xc, ((0, 0), (0, 0), (pad, pad)), mode='edge')
        trend = jnp.stack([xp[..., i:i + L] for i in range(self.kernel_size)],
                          axis=0).mean(axis=0)                  # (B, C, L)
        seasonal = xc - trend
        out = (seasonal @ self.ws_t + self.bs
               + trend @ self.wt_t + self.bt)                   # (B, C, P)
        return jnp.transpose(out, (0, 2, 1))                    # (B, P, C)


if __name__ == "__main__":
    key = jax.random.PRNGKey(0)
    kx, kp = jax.random.split(key)

    B, C = 2, 4
    seq_len, pred_len, moving_avg = 16, 8, 5

    model = DLinearPallas(seq_len, pred_len, moving_avg, kp)
    x = jax.random.normal(kx, (B, seq_len, C), jnp.float32)

    # f32 compute path -- exact match to the reference.
    out = jax.block_until_ready(model(x))
    ref = model.reference(x)
    assert out.shape == (B, pred_len, C)
    assert jnp.allclose(out, ref, atol=1e-5, rtol=1e-5)

    # bf16 compute path (halved HBM bytes, MXU-native on v6e/v7x), f32 accum.
    out_bf16 = jax.block_until_ready(model(x, compute_dtype=jnp.bfloat16))
    assert out_bf16.shape == (B, pred_len, C)
    assert jnp.allclose(out_bf16, ref, atol=1e-2, rtol=1e-2)

    print("KERNEL_OK")
</pallas_src>

<mosaic_0001>
module attributes {stable_mosaic.version = 11 : i64} {
  func.func @_dlinear_kernel(%arg0: i32, %arg1: memref<1x16x4xf32, #tpu.memory_space<vmem>>, %arg2: memref<8x16xf32, #tpu.memory_space<vmem>>, %arg3: memref<8x1xf32, #tpu.memory_space<vmem>>, %arg4: memref<1x8x4xf32, #tpu.memory_space<vmem>>) attributes {dimension_semantics = [#tpu.dimension_semantics<parallel>], iteration_bounds = array<i64: 2>, scalar_prefetch = 0 : i64, scratch_operands = 0 : i64, tpu.core_type = #tpu.core_type<tc>, window_params = [{transform_indices = @transform_0, window_bounds = array<i64: 1, 16, 4>}, {pipeline_mode = #tpu.pipeline_mode<synchronous>, transform_indices = @transform_1, window_bounds = array<i64: 8, 16>}, {pipeline_mode = #tpu.pipeline_mode<synchronous>, transform_indices = @transform_2, window_bounds = array<i64: 8, 1>}, {transform_indices = @transform_3, window_bounds = array<i64: 1, 8, 4>}]} {
    %c0 = arith.constant 0 : index
    %c0_0 = arith.constant 0 : index
    %0 = vector.load %arg2[%c0, %c0_0] : memref<8x16xf32, #tpu.memory_space<vmem>>, vector<8x16xf32>
    %c0_1 = arith.constant 0 : index
    %c0_2 = arith.constant 0 : index
    %c0_3 = arith.constant 0 : index
    %1 = vector.load %arg1[%c0_1, %c0_2, %c0_3] : memref<1x16x4xf32, #tpu.memory_space<vmem>>, vector<1x16x4xf32>
    %2 = vector.shape_cast %1 : vector<1x16x4xf32> to vector<16x4xf32>
    %cst = arith.constant dense<0.000000e+00> : vector<8x4xf32>
    %3 = tpu.matmul %0, %2, %cst {dimension_numbers = #tpu.dot_dimension_numbers<[1], [0], [0], [1], [0, 0, 1, 1], [], []>} : vector<8x16xf32>, vector<16x4xf32>, vector<8x4xf32> -> vector<8x4xf32>
    %c0_4 = arith.constant 0 : index
    %c0_5 = arith.constant 0 : index
    %4 = vector.load %arg3[%c0_4, %c0_5] : memref<8x1xf32, #tpu.memory_space<vmem>>, vector<8x1xf32>
    %5 = vector.broadcast %4 : vector<8x1xf32> to vector<8x4xf32>
    %6 = arith.addf %3, %5 : vector<8x4xf32>
    %c0_6 = arith.constant 0 : index
    %c0_7 = arith.constant 0 : index
    %c0_8 = arith.constant 0 : index
    %7 = vector.load %arg4[%c0_6, %c0_7, %c0_8] : memref<1x8x4xf32, #tpu.memory_space<vmem>>, vector<1x8x4xf32>
    %8 = vector.shape_cast %7 : vector<1x8x4xf32> to vector<8x4xf32>
    %9 = vector.shape_cast %6 : vector<8x4xf32> to vector<1x8x4xf32>
    tpu.vector_store %arg4[%c0_6, %c0_7, %c0_8], %9 {strides = array<i32>} : memref<1x8x4xf32, #tpu.memory_space<vmem>>, vector<1x8x4xf32>,
    return
  }
  func.func @transform_0(%arg0: i32) -> (i32, i32, i32) {
    %c0_i32 = arith.constant 0 : i32
    %c0_i32_0 = arith.constant 0 : i32
    %c0_i32_1 = arith.constant 0 : i32
    return %arg0, %c0_i32, %c0_i32_0 : i32, i32, i32
  }
  func.func @transform_1(%arg0: i32) -> (i32, i32) {
    %c0_i32 = arith.constant 0 : i32
    %c0_i32_0 = arith.constant 0 : i32
    %c0_i32_1 = arith.constant 0 : i32
    return %c0_i32, %c0_i32_0 : i32, i32
  }
  func.func @transform_2(%arg0: i32) -> (i32, i32) {
    %c0_i32 = arith.constant 0 : i32
    %c0_i32_0 = arith.constant 0 : i32
    %c0_i32_1 = arith.constant 0 : i32
    return %c0_i32, %c0_i32_0 : i32, i32
  }
  func.func @transform_3(%arg0: i32) -> (i32, i32, i32) {
    %c0_i32 = arith.constant 0 : i32
    %c0_i32_0 = arith.constant 0 : i32
    %c0_i32_1 = arith.constant 0 : i32
    return %arg0, %c0_i32, %c0_i32_0 : i32, i32, i32
  }
}

</mosaic_0001>

<bundles_post_ra>
// kernel: _dlinear_pallas.1
= control target key start
LH: loop header
LB: loop body
LE: loop exit
PB: predicated region body
PF: predicated region fallthrough
CT: control target
= control target key end

     0   :  { %s377_s12 = smov 0   ;;  %s400_s0 = inlined_call_operand.vmem [shape: f32[2,16,4], index: 0, kind: input, shape index: {}]   ;;  %s401_s1 = inlined_call_operand.vmem [shape: f32[8,16], index: 1, kind: input, shape index: {}]   ;;  %s402_s2 = inlined_call_operand.vmem [shape: f32[8,1], index: 2, kind: input, shape index: {}]   ;;  %s403_s3 = inlined_call_operand.vmem [shape: f32[2,8,4], index: 3, kind: output, shape index: {}]  }
   0x1 LB: > { %s307_s13 = sadd.s32 4294967295, %s351_s12   ;;  %p311_p0 = scmp.ge.s32.totalorder %s351_s12, 1  ;;  %s351_s12 = sphi %s377_s12, %s13_s12  }
   0x2   : > { %p137_p1 = scmp.lt.s32.totalorder %s351_s12, 3 }
   0x4   : > { %p138_p2 = pnand %p311_p0, %p137_p1 }
   0x5   : > { %p160_p3 = scmp.lt.s32.totalorder (!%p138_p2), %s307_s13, 1  ;;  %v353_v0 = vmov (!%p138_p2), 0.0|0.0   ;;  %vm354_vm0 = vmmov (!%p138_p2), 0   ;;  %v355_v1 = vmov (!%p138_p2), 0.0   ;;  %v172_v2 = vld [vmem:[%s402_s2] sm:$0xff] (!%p138_p2)  ;;  %v356_v3 = vmov (!%p138_p2), 0  }
   0x6   : > { %141 = sbr.rel (%p138_p2) target bundleno = 237 (0xed), region = 32  ;;  %329 = vmatprep.subr.bf16.mxu0 (!%p138_p2), %v353_v0  ;;  %326 = vmatprep.mubr.msk.f32.mxu0 (!%p138_p2), %vm354_vm0, %v355_v1  ;;  %v169_v7 = vld [vmem:[%s401_s1] sm:$0xff] (!%p138_p2)  ;;  %vm178_vm1 = vcmask (!%p138_p2), 130048   ;;  %vm252_vm2 = vcmask (!%p138_p2), 31744  }
   0x7   : > { %344 = vset.pattern.permute.xlu0 (!%p138_p2), %v356_v3 }
   0x8   : > { %175 = vperm.xlu0 (!%p138_p2), %344, %v172_v2  }
   0xd   : > { %s405_s13 = smov (!%p160_p3, %s307_s13), 1 }
   0xe   : > { %s318_s16 = sshll.u32 %s405_s13, 4  ;;  %s314_s22 = sshll.u32 %s405_s13, 3 }
   0xf   : > { %s164_s19 = scalar_lea.vmem %s400_s0, %s318_s16  ;;  %s168_s25 = scalar_lea.vmem %s403_s3, %s314_s22 }
  0x10   : > { %v170_v4 = vld [vmem:[%s164_s19] sm:$0xff]  ;;  %v171_v5 = vld [vmem:[%s164_s19 + $0x8] sm:$0xff] }
  0x11   : > { %v330_v6 = vpack.c.bf16 %v171_v5, %v170_v4 }
  0x13   : > { %331 = vmatpush3.bf16.msra.mxu0 %v330_v6 }
  0x16   : > { %327 = vmatmul.mubr.msk.f32.vlgmr.msra.gmra.mrb[0].mxu0 %vm178_vm1, %v169_v7 }
  0x87   : > { %v176_v8 = vpop.permute.xlu0 %175 }
  0xe9   : > { %v248_v9 = vpop.f32.mrb[0].mxu0 }
  0xea   : > { %v249_v10 = vadd.f32 %v248_v9, %v176_v8  ;;  %v328_v11 = vpop.f32.mrb[1].mxu0 }
  0xec   : > { %253 = vst.msk [vmem:[%s168_s25] sm:$0xff] %vm252_vm2, %v249_v10 }
  0xed PF: > { %s13_s12 = sadd.s32 1, %s351_s12  }
  0xee   : > { %p10_p4 = scmp.ge.s32.totalorder %s13_s12, 4  }
  0xf0   :  { %12 = sbr.rel (!%p10_p4) target bundleno = 1 (0x1), region = 62 }

</bundles_post_ra>
